<compile_context>
chip_gen: v7x
topology: tpu7x:2x2x1
jax: 0.10.0
libtpu: 0.0.40
codegen_flags: <defaults>
</compile_context>

<pallas_src>
import functools

import jax
import jax.numpy as jnp
from jax.experimental import pallas as pl
from jax.experimental.pallas import tpu as pltpu

EPS = 1e-5
LANE = 128        # lane width: every layer-output dim is padded to this
ROW_ALIGN = 16    # bf16 sublane packing for the MXU LHS / batch tiles


def _round_up(x, m):
    return (x + m - 1) // m * m


def _vmem_ceiling_bytes():
    """Generation-aware VMEM cap: ~3/4 of physical, never above 100 MiB.

    v7x (64 MiB physical) -> ~48 MiB (headroom for Mosaic internal scratch);
    v5e/v6e (128 MiB)      -> ~96 MiB.  Falls back conservatively if the query
    is unavailable.
    """
    cap = 64 << 20
    try:
        info = pltpu.get_tpu_info()
        cap = int(getattr(info, "vmem_capacity_bytes", cap) or cap)
    except Exception:
        pass
    return min((cap * 3) // 4, 100 << 20)


def _mlp_kernel(n_layers, matmul_dtype, x_ref, *refs):
    """One batch tile: Linear/ReLU chain (BatchNorm already folded into layer 0)."""
    param_refs = refs[:2 * n_layers]
    out_ref = refs[-1]

    h = x_ref[...]                                     # (tile_n, d_in), matmul dtype
    for i in range(n_layers):
        w = param_refs[2 * i][...]                     # (K_i, Dp_{i+1}), matmul dtype
        b = param_refs[2 * i + 1][...]                 # (1,   Dp_{i+1}), f32
        h = jnp.dot(h, w, preferred_element_type=jnp.float32) + b
        if i != n_layers - 1:
            h = jnp.maximum(h, 0.0).astype(matmul_dtype)   # ReLU; Dropout(0.0)=id
    out_ref[...] = h.astype(out_ref.dtype)


def pack_params(weights, biases, *, matmul_dtype=jnp.bfloat16):
    """One-time packing: transpose to (in, out), pad output dims to 128 lanes, cast.

    Layer 0's weight stays f32 so the per-batch BatchNorm affine can be folded
    into it cheaply on every forward call; its K dim stays at the TRUE d_in.
    """
    d_in = int(weights[0].shape[1])
    dims = [d_in] + [int(w.shape[0]) for w in weights]
    dims_eff = [d_in] + [_round_up(d, LANE) for d in dims[1:]]
    # TODO(synk): on v6e/v7x, pad hidden widths >128 to multiples of 256 to fill
    # the 2x256x256 MXU; at these widths the kernel is memory-bound so 128 is fine.

    ws, bs = [], []
    for i, (w, b) in enumerate(zip(weights, biases)):
        di, do = dims_eff[i], dims_eff[i + 1]
        wt = jnp.asarray(w, jnp.float32).T                       # (in_i, out_i)
        wp = jnp.zeros((di, do), jnp.float32).at[:wt.shape[0], :wt.shape[1]].set(wt)
        bp = jnp.zeros((1, do), jnp.float32).at[0, :b.shape[0]].set(
            jnp.asarray(b, jnp.float32))
        ws.append(wp if i == 0 else wp.astype(matmul_dtype))
        bs.append(bp)
    return dict(w=ws, b=bs, dims_eff=dims_eff, d_out=dims[-1],
                matmul_dtype=matmul_dtype)


def batchnorm_mlp_forward(x, gamma, beta, packed, *, tile_n=1024):
    """x: (N, input_dim) f32; packed: output of pack_params."""
    n, d_in = x.shape
    matmul_dtype = packed["matmul_dtype"]
    dims_eff = packed["dims_eff"]
    n_layers = len(packed["w"])
    d_out = packed["d_out"]
    dp_out = dims_eff[-1]
    assert d_in == dims_eff[0]

    # ---- BatchNorm1d (training mode) batch stats, folded into layer 0 -------
    x32 = x.astype(jnp.float32)
    mean = jnp.mean(x32, axis=0)
    var = jnp.mean(jnp.square(x32 - mean), axis=0)          # biased variance
    inv_std = jax.lax.rsqrt(var + EPS)
    scale = gamma.astype(jnp.float32) * inv_std              # (d_in,)
    shift = beta.astype(jnp.float32) - mean * scale          # (d_in,)
    # TODO(synk): running_mean/running_var buffer updates (PyTorch training-mode
    # side effect) are not part of the forward output and are not emitted here.

    w0 = packed["w"][0]                                      # (d_in, Dp1) f32
    w0_folded = (scale[:, None] * w0).astype(matmul_dtype)   # diag(scale) @ W0^T
    b0_folded = packed["b"][0] + (shift @ w0)[None, :]       # (1, Dp1) f32

    params = [w0_folded, b0_folded]
    for i in range(1, n_layers):
        params.append(packed["w"][i])
        params.append(packed["b"][i])

    x_mm = x.astype(matmul_dtype)          # bf16 fast path halves input HBM bytes

    # ---- batch tiling: big tiles, 16-row aligned, >=2 grid steps when possible
    tile_cap = _round_up(max(pl.cdiv(n, 2), 1), ROW_ALIGN)
    tile_n = max(ROW_ALIGN, min(_round_up(int(tile_n), ROW_ALIGN),
                                tile_cap, _round_up(n, ROW_ALIGN)))
    grid = (pl.cdiv(n, tile_n),)

    def _resident_spec(a):
        # Full-array block, constant index map -> VMEM-resident across steps.
        # NOTE: if hidden widths ever grow enough that double-buffered resident
        # params threaten v7x's 64 MiB, add pipeline_mode=pl.Buffered(1) here.
        return pl.BlockSpec(a.shape, lambda i, nd=a.ndim: (0,) * nd)

    in_specs = [pl.BlockSpec((tile_n, d_in), lambda i: (i, 0))]
    in_specs += [_resident_spec(a) for a in params]
    out_spec = pl.BlockSpec((tile_n, dp_out), lambda i: (i, 0))

    # ---- VMEM budget: double-buffered x/out tiles + resident params (x2 for
    #      their pipeline buffers) + per-layer f32 intermediates and casts -----
    itm = jnp.dtype(matmul_dtype).itemsize
    io_tile_bytes = 2 * tile_n * d_in * itm + 2 * tile_n * dp_out * itm
    param_bytes = sum(int(a.size) * a.dtype.itemsize for a in params)
    interm_bytes = sum(tile_n * dims_eff[i + 1] * (4 + itm) for i in range(n_layers))
    needed = io_tile_bytes + 2 * param_bytes + interm_bytes
    vmem_limit = int(min(_vmem_ceiling_bytes(), max(16 << 20, 2 * needed)))

    flops = 2 * n * sum(dims_eff[i] * dims_eff[i + 1] for i in range(n_layers))
    bytes_accessed = n * d_in * itm + n * dp_out * itm + param_bytes
    cost = pl.CostEstimate(flops=int(flops), transcendentals=0,
                           bytes_accessed=int(bytes_accessed))

    kernel = functools.partial(_mlp_kernel, n_layers, matmul_dtype)
    out_p = pl.pallas_call(
        kernel,
        out_shape=jax.ShapeDtypeStruct((n, dp_out), matmul_dtype),
        grid=grid,
        in_specs=in_specs,
        out_specs=out_spec,
        compiler_params=pltpu.CompilerParams(
            dimension_semantics=("parallel",),     # shards batch tiles over TCs
            vmem_limit_bytes=vmem_limit),
        cost_estimate=cost,
    )(x_mm, *params)

    return out_p[:, :d_out].astype(jnp.float32)


def batchnorm_mlp(x, gamma, beta, weights, biases, *,
                  tile_n=1024, matmul_dtype=jnp.bfloat16):
    """One-shot convenience wrapper (re-packs params per call; prefer
    pack_params + batchnorm_mlp_forward in a hot loop)."""
    packed = pack_params(weights, biases, matmul_dtype=matmul_dtype)
    return batchnorm_mlp_forward(x, gamma, beta, packed, tile_n=tile_n)


def reference(x, gamma, beta, weights, biases):
    """Pure-JAX reference matching PyTorch BatchNorm1d(training) + Linear/ReLU."""
    x = x.astype(jnp.float32)
    mean = jnp.mean(x, axis=0)
    var = jnp.mean(jnp.square(x - mean), axis=0)
    inv_std = jax.lax.rsqrt(var + EPS)
    h = (x - mean) * inv_std * gamma + beta
    for i, (w, b) in enumerate(zip(weights, biases)):
        h = jnp.dot(h, w.T, preferred_element_type=jnp.float32) + b
        if i != len(weights) - 1:
            h = jnp.maximum(h, 0.0)
    return h


if __name__ == "__main__":
    # Shapes consistent with BatchNormMLP(16, [32, 64], 8)
    input_dim, hidden_dims, output_dim = 16, [32, 64], 8
    batch = 8
    layer_sizes = [input_dim] + hidden_dims + [output_dim]

    key = jax.random.PRNGKey(0)
    key, kx = jax.random.split(key)
    x = jax.random.normal(kx, (batch, input_dim), dtype=jnp.float32)

    # BatchNorm affine init (weight=1, bias=0), Linear init ~U(+-1/sqrt(fan_in)).
    gamma = jnp.ones((input_dim,), jnp.float32)
    beta = jnp.zeros((input_dim,), jnp.float32)

    weights, biases = [], []
    for i in range(len(layer_sizes) - 1):
        fan_in, fan_out = layer_sizes[i], layer_sizes[i + 1]
        key, kw, kb = jax.random.split(key, 3)
        bound = 1.0 / (fan_in ** 0.5)
        weights.append(jax.random.uniform(
            kw, (fan_out, fan_in), minval=-bound, maxval=bound, dtype=jnp.float32))
        biases.append(jax.random.uniform(
            kb, (fan_out,), minval=-bound, maxval=bound, dtype=jnp.float32))

    ref = reference(x, gamma, beta, weights, biases)

    # Exact-ish path: f32 MXU operands, BN fold done in f32 -> tight tolerance.
    packed_f32 = pack_params(weights, biases, matmul_dtype=jnp.float32)
    out_f32 = jax.block_until_ready(
        batchnorm_mlp_forward(x, gamma, beta, packed_f32))
    assert out_f32.shape == (batch, output_dim)
    assert jnp.allclose(out_f32, ref, atol=1e-4, rtol=1e-4), "f32 mismatch vs reference"

    # Fast path: bf16 x / weights / output, f32 accumulation -> bf16 tolerance.
    packed_bf16 = pack_params(weights, biases, matmul_dtype=jnp.bfloat16)
    out_bf16 = jax.block_until_ready(
        batchnorm_mlp_forward(x, gamma, beta, packed_bf16))
    assert out_bf16.shape == (batch, output_dim)
    assert jnp.allclose(out_bf16, ref, atol=3e-2, rtol=3e-2), "bf16 mismatch vs reference"

    print("KERNEL_OK")
</pallas_src>

<mosaic_0001>
module attributes {stable_mosaic.version = 11 : i64} {
  func.func @_mlp_kernel(%arg0: i32, %arg1: memref<16x16xf32, #tpu.memory_space<vmem>>, %arg2: memref<16x128xf32, #tpu.memory_space<vmem>>, %arg3: memref<1x128xf32, #tpu.memory_space<vmem>>, %arg4: memref<128x128xf32, #tpu.memory_space<vmem>>, %arg5: memref<1x128xf32, #tpu.memory_space<vmem>>, %arg6: memref<128x128xf32, #tpu.memory_space<vmem>>, %arg7: memref<1x128xf32, #tpu.memory_space<vmem>>, %arg8: memref<16x128xf32, #tpu.memory_space<vmem>>) attributes {dimension_semantics = [#tpu.dimension_semantics<parallel>], iteration_bounds = array<i64: 1>, scalar_prefetch = 0 : i64, scratch_operands = 0 : i64, tpu.core_type = #tpu.core_type<tc>, window_params = [{transform_indices = @transform_0, window_bounds = array<i64: 16, 16>}, {pipeline_mode = #tpu.pipeline_mode<synchronous>, transform_indices = @transform_1, window_bounds = array<i64: 16, 128>}, {pipeline_mode = #tpu.pipeline_mode<synchronous>, transform_indices = @transform_2, window_bounds = array<i64: 1, 128>}, {pipeline_mode = #tpu.pipeline_mode<synchronous>, transform_indices = @transform_3, window_bounds = array<i64: 128, 128>}, {pipeline_mode = #tpu.pipeline_mode<synchronous>, transform_indices = @transform_4, window_bounds = array<i64: 1, 128>}, {pipeline_mode = #tpu.pipeline_mode<synchronous>, transform_indices = @transform_5, window_bounds = array<i64: 128, 128>}, {pipeline_mode = #tpu.pipeline_mode<synchronous>, transform_indices = @transform_6, window_bounds = array<i64: 1, 128>}, {transform_indices = @transform_7, window_bounds = array<i64: 16, 128>}]} {
    %c0 = arith.constant 0 : index
    %c0_0 = arith.constant 0 : index
    %0 = vector.load %arg1[%c0, %c0_0] : memref<16x16xf32, #tpu.memory_space<vmem>>, vector<16x16xf32>
    %c0_1 = arith.constant 0 : index
    %c0_2 = arith.constant 0 : index
    %1 = vector.load %arg2[%c0_1, %c0_2] : memref<16x128xf32, #tpu.memory_space<vmem>>, vector<16x128xf32>
    %c0_3 = arith.constant 0 : index
    %c0_4 = arith.constant 0 : index
    %2 = vector.load %arg3[%c0_3, %c0_4] : memref<1x128xf32, #tpu.memory_space<vmem>>, vector<1x128xf32>
    %cst = arith.constant dense<0.000000e+00> : vector<16x128xf32>
    %3 = tpu.matmul %0, %1, %cst {dimension_numbers = #tpu.dot_dimension_numbers<[1], [0], [0], [1], [0, 0, 1, 1], [], []>} : vector<16x16xf32>, vector<16x128xf32>, vector<16x128xf32> -> vector<16x128xf32>
    %4 = vector.broadcast %2 : vector<1x128xf32> to vector<16x128xf32>
    %5 = arith.addf %3, %4 : vector<16x128xf32>
    %cst_5 = arith.constant 0.000000e+00 : f32
    %6 = vector.broadcast %cst_5 : f32 to vector<16x128xf32>
    %7 = arith.maximumf %5, %6 : vector<16x128xf32>
    %c0_6 = arith.constant 0 : index
    %c0_7 = arith.constant 0 : index
    %8 = vector.load %arg4[%c0_6, %c0_7] : memref<128x128xf32, #tpu.memory_space<vmem>>, vector<128x128xf32>
    %c0_8 = arith.constant 0 : index
    %c0_9 = arith.constant 0 : index
    %9 = vector.load %arg5[%c0_8, %c0_9] : memref<1x128xf32, #tpu.memory_space<vmem>>, vector<1x128xf32>
    %cst_10 = arith.constant dense<0.000000e+00> : vector<16x128xf32>
    %10 = tpu.matmul %7, %8, %cst_10 {dimension_numbers = #tpu.dot_dimension_numbers<[1], [0], [0], [1], [0, 0, 1, 1], [], []>} : vector<16x128xf32>, vector<128x128xf32>, vector<16x128xf32> -> vector<16x128xf32>
    %11 = vector.broadcast %9 : vector<1x128xf32> to vector<16x128xf32>
    %12 = arith.addf %10, %11 : vector<16x128xf32>
    %cst_11 = arith.constant 0.000000e+00 : f32
    %13 = vector.broadcast %cst_11 : f32 to vector<16x128xf32>
    %14 = arith.maximumf %12, %13 : vector<16x128xf32>
    %c0_12 = arith.constant 0 : index
    %c0_13 = arith.constant 0 : index
    %15 = vector.load %arg6[%c0_12, %c0_13] : memref<128x128xf32, #tpu.memory_space<vmem>>, vector<128x128xf32>
    %c0_14 = arith.constant 0 : index
    %c0_15 = arith.constant 0 : index
    %16 = vector.load %arg7[%c0_14, %c0_15] : memref<1x128xf32, #tpu.memory_space<vmem>>, vector<1x128xf32>
    %cst_16 = arith.constant dense<0.000000e+00> : vector<16x128xf32>
    %17 = tpu.matmul %14, %15, %cst_16 {dimension_numbers = #tpu.dot_dimension_numbers<[1], [0], [0], [1], [0, 0, 1, 1], [], []>} : vector<16x128xf32>, vector<128x128xf32>, vector<16x128xf32> -> vector<16x128xf32>
    %18 = vector.broadcast %16 : vector<1x128xf32> to vector<16x128xf32>
    %19 = arith.addf %17, %18 : vector<16x128xf32>
    %c0_17 = arith.constant 0 : index
    %c0_18 = arith.constant 0 : index
    %20 = vector.load %arg8[%c0_17, %c0_18] : memref<16x128xf32, #tpu.memory_space<vmem>>, vector<16x128xf32>
    tpu.vector_store %arg8[%c0_17, %c0_18], %19 {strides = array<i32>} : memref<16x128xf32, #tpu.memory_space<vmem>>, vector<16x128xf32>,
    return
  }
  func.func @transform_0(%arg0: i32) -> (i32, i32) {
    %c0_i32 = arith.constant 0 : i32
    %c0_i32_0 = arith.constant 0 : i32
    return %arg0, %c0_i32 : i32, i32
  }
  func.func @transform_1(%arg0: i32) -> (i32, i32) {
    %c0_i32 = arith.constant 0 : i32
    %c0_i32_0 = arith.constant 0 : i32
    %c0_i32_1 = arith.constant 0 : i32
    return %c0_i32, %c0_i32_0 : i32, i32
  }
  func.func @transform_2(%arg0: i32) -> (i32, i32) {
    %c0_i32 = arith.constant 0 : i32
    %c0_i32_0 = arith.constant 0 : i32
    %c0_i32_1 = arith.constant 0 : i32
    return %c0_i32, %c0_i32_0 : i32, i32
  }
  func.func @transform_3(%arg0: i32) -> (i32, i32) {
    %c0_i32 = arith.constant 0 : i32
    %c0_i32_0 = arith.constant 0 : i32
    %c0_i32_1 = arith.constant 0 : i32
    return %c0_i32, %c0_i32_0 : i32, i32
  }
  func.func @transform_4(%arg0: i32) -> (i32, i32) {
    %c0_i32 = arith.constant 0 : i32
    %c0_i32_0 = arith.constant 0 : i32
    %c0_i32_1 = arith.constant 0 : i32
    return %c0_i32, %c0_i32_0 : i32, i32
  }
  func.func @transform_5(%arg0: i32) -> (i32, i32) {
    %c0_i32 = arith.constant 0 : i32
    %c0_i32_0 = arith.constant 0 : i32
    %c0_i32_1 = arith.constant 0 : i32
    return %c0_i32, %c0_i32_0 : i32, i32
  }
  func.func @transform_6(%arg0: i32) -> (i32, i32) {
    %c0_i32 = arith.constant 0 : i32
    %c0_i32_0 = arith.constant 0 : i32
    %c0_i32_1 = arith.constant 0 : i32
    return %c0_i32, %c0_i32_0 : i32, i32
  }
  func.func @transform_7(%arg0: i32) -> (i32, i32) {
    %c0_i32 = arith.constant 0 : i32
    %c0_i32_0 = arith.constant 0 : i32
    return %arg0, %c0_i32 : i32, i32
  }
}

</mosaic_0001>

<bundles_post_ra>
// kernel: tpu_custom_call.1
= control target key start
LH: loop header
LB: loop body
LE: loop exit
PB: predicated region body
PF: predicated region fallthrough
CT: control target
= control target key end

     0   :  { %12 = vsyncpa [#allocation3], 0  ;;  %s859_s0 = inlined_call_operand.hbm [shape: f32[8,16], index: 0, kind: input, shape index: {}]   ;;  %s860_s1 = inlined_call_operand.hbm [shape: f32[16,128], index: 1, kind: input, shape index: {}]   ;;  %s861_s2 = inlined_call_operand.vmem [shape: f32[1,128], index: 2, kind: input, shape index: {}]   ;;  %s862_s3 = inlined_call_operand.hbm [shape: f32[128,128], index: 3, kind: input, shape index: {}]   ;;  %s863_s4 = inlined_call_operand.vmem [shape: f32[1,128], index: 4, kind: input, shape index: {}]   ;;  %s864_s5 = inlined_call_operand.hbm [shape: f32[128,128], index: 5, kind: input, shape index: {}]   ;;  %s865_s6 = inlined_call_operand.vmem [shape: f32[1,128], index: 6, kind: input, shape index: {}]   ;;  %s866_s7 = inlined_call_operand.hbm [shape: f32[8,128], index: 7, kind: output, shape index: {}]  }
   0x1   :  { %13 = vsyncpa [#allocation6], 0 }
   0x2   :  { %14 = vsyncpa [#allocation9], 0 }
   0x3   :  { %15 = vsyncpa [#allocation4], 0 }
   0x4   :  { %20 = vsyncadd [#allocation3], 128  ;;  %s711_s24 = smov [#allocation5]   ;;  %s712_s26 = smov [#allocation2]  }
   0x5   :  { %s33_s25 = sshll.u32 %s711_s24, 4  ;;  %s21_s27 = sshll.u32 %s712_s26, 4  ;;  %s34_s25 = int_to_ptr.vmem [resolvable:$true] %s33_s25  ;;  %s758_s27 = int_to_ptr.vmem [resolvable:$true] %s21_s27 }
   0x6   :  { %s593_s30 = scalar_lea.hbm %s860_s1, 256 }
   0x7   :  { %p594_p0 = scmp.ne.s32.totalorder %s860_s1, %s593_s30  ;;  %p597_p1 = scmp.lt.u32.totalorder %s593_s30, %s860_s1 }
   0x9   :  { %p599_p2 = pnand %p597_p1, %p594_p0 }
   0xb   :  { %602 = shalt.err (!%p599_p2)
}
   0xc   :  { %s603_s12 = scalar_lea.vmem %s34_s25, 256  ;;  %p608_p4 = scmp.lt.s32.totalorder %s34_s25, %s34_s25 }
   0xd   :  { %p604_p3 = scmp.ne.s32.totalorder %s34_s25, %s603_s12  ;;  %p609_p5 = scmp.lt.s32.totalorder %s603_s12, %s603_s12 }
   0xf   :  { %p610_p6 = por %p609_p5, %p608_p4 }
  0x11   :  { %p611_p7 = pnand %p610_p6, %p604_p3 }
  0x13   :  { %614 = shalt.err (!%p611_p7)
}
  0x14   :  { %s713_s13 = smov 128   ;;  %s714_s14 = smov 8  }
  0x15   :  { %39 = dma.hbm_to_vmem [thread:$0]  %s860_s1, 256, %s34_s25, [#allocation6], %s713_s13, %s713_s13, %s714_s14  }
  0x16   :  { %s615_s19 = scalar_lea.hbm %s859_s0, 128 }
  0x17   :  { %p616_p8 = scmp.ne.s32.totalorder %s859_s0, %s615_s19  ;;  %p619_p9 = scmp.lt.u32.totalorder %s615_s19, %s859_s0 }
  0x19   :  { %p621_p10 = pnand %p619_p9, %p616_p8 }
  0x1b   :  { %624 = shalt.err (!%p621_p10)
}
  0x1c   :  { %s625_s24 = scalar_lea.vmem %s758_s27, 128  ;;  %s629_s1 = scalar_lea.vmem %s758_s27, 256 }
  0x1d   :  { %p626_p11 = scmp.ne.s32.totalorder %s758_s27, %s625_s24  ;;  %p630_p12 = scmp.lt.s32.totalorder %s758_s27, %s758_s27 }
  0x1e   :  { %p631_p13 = scmp.lt.s32.totalorder %s629_s1, %s625_s24 }
  0x20   :  { %p632_p0 = por %p631_p13, %p630_p12 }
  0x22   :  { %p633_p1 = pnand %p632_p0, %p626_p11 }
  0x24   :  { %636 = shalt.err (!%p633_p1)
}
  0x25   :  { %27 = dma.hbm_to_vmem [thread:$0]  %s859_s0, 128, %s758_s27, [#allocation3], %s713_s13, %s713_s13, %s714_s14  }
  0x26   :  { %s715_s28 = smov [#allocation7]   ;;  %s716_s30 = smov [#allocation8]  }
  0x27   :  { %s47_s29 = sshll.u32 %s715_s28, 4  ;;  %s61_s8 = sshll.u32 %s716_s30, 4  ;;  %s48_s29 = int_to_ptr.vmem [resolvable:$true] %s47_s29  ;;  %s796_s8 = int_to_ptr.vmem [resolvable:$true] %s61_s8 }
  0x28   :  { %s637_s11 = scalar_lea.hbm %s862_s3, 2048 }
  0x29   :  { %p638_p2 = scmp.ne.s32.totalorder %s862_s3, %s637_s11  ;;  %p641_p3 = scmp.lt.u32.totalorder %s637_s11, %s862_s3 }
  0x2b   :  { %p643_p4 = pnand %p641_p3, %p638_p2 }
  0x2d   :  { %646 = shalt.err (!%p643_p4)
}
  0x2e   :  { %s647_s0 = scalar_lea.vmem %s48_s29, 2048  ;;  %p652_p6 = scmp.lt.s32.totalorder %s48_s29, %s48_s29 }
  0x2f   :  { %p648_p5 = scmp.ne.s32.totalorder %s48_s29, %s647_s0  ;;  %p653_p7 = scmp.lt.s32.totalorder %s647_s0, %s647_s0 }
  0x31   :  { %p654_p8 = por %p653_p7, %p652_p6 }
  0x33   :  { %p655_p9 = pnand %p654_p8, %p648_p5 }
  0x35   :  { %658 = shalt.err (!%p655_p9)
}
  0x36   :  { %53 = dma.hbm_to_vmem [thread:$0]  %s862_s3, 2048, %s48_s29, [#allocation6], %s713_s13, %s713_s13, %s714_s14  }
  0x37   :  { %s659_s21 = scalar_lea.hbm %s864_s5, 2048 }
  0x38   :  { %p660_p10 = scmp.ne.s32.totalorder %s864_s5, %s659_s21  ;;  %p663_p11 = scmp.lt.u32.totalorder %s659_s21, %s864_s5 }
  0x3a   :  { %p665_p12 = pnand %p663_p11, %p660_p10 }
  0x3c   :  { %668 = shalt.err (!%p665_p12)
}
  0x3d   :  { %s669_s25 = scalar_lea.vmem %s796_s8, 2048  ;;  %p674_p0 = scmp.lt.s32.totalorder %s796_s8, %s796_s8 }
  0x3e   :  { %p670_p13 = scmp.ne.s32.totalorder %s796_s8, %s669_s25  ;;  %p675_p1 = scmp.lt.s32.totalorder %s669_s25, %s669_s25 }
  0x40   :  { %p676_p2 = por %p675_p1, %p674_p0 }
  0x42   :  { %p677_p3 = pnand %p676_p2, %p670_p13 }
  0x44   :  { %680 = shalt.err (!%p677_p3)
}
  0x45   :  { %67 = dma.hbm_to_vmem [thread:$0]  %s864_s5, 2048, %s796_s8, [#allocation9], %s713_s13, %s713_s13, %s714_s14  }
  0x46   :  { %703 = dma.done.wait [#allocation3], 256  }
  0x47   :  { %704 = vsyncadd [#allocation3], 4294967040 }
  0x48   :  { %705 = dma.done.wait [#allocation6], 2304  }
  0x49   :  { %706 = vsyncadd [#allocation6], 4294964992 }
  0x4a   :  { %707 = dma.done.wait [#allocation9], 2048  }
  0x4b   :  { %708 = vsyncadd [#allocation9], 4294965248  ;;  %vm93_vm0 = vcmask 130048   ;;  %v84_v0 = vld [vmem:[#allocation5] sm:$0xff]  ;;  %v85_v1 = vld [vmem:[#allocation5 + $0x8] sm:$0xff] }
  0x4c   :  { %v82_v2 = vld [vmem:[#allocation2] sm:$0xff]  ;;  %v518_v3 = vpack.c.bf16 %v85_v1, %v84_v0  ;;  %v178_v5 = vld [vmem:[#allocation7 + $0x8] sm:$0xff]  ;;  %v179_v7 = vld [vmem:[#allocation7 + $0x10] sm:$0xff] }
  0x4d   :  { %445 = vmatprep.mubr.msk.f32.mxu0 %vm93_vm0, %v82_v2  ;;  %v177_v4 = vld [vmem:[#allocation7] sm:$0xff]  ;;  %v180_v8 = vld [vmem:[#allocation7 + $0x18] sm:$0xff]  ;;  %v182_v11 = vld [vmem:[#allocation7 + $0x28] sm:$0xff] }
  0x4e   :  { %v522_v6 = vpack.c.bf16 %v178_v5, %v177_v4  ;;  %519 = vmatprep.subr.bf16.mxu0 %v518_v3  ;;  %v526_v9 = vpack.c.bf16 %v180_v8, %v179_v7  ;;  %v181_v10 = vld [vmem:[#allocation7 + $0x20] sm:$0xff]  ;;  %v83_v12 = vld [vmem:[#allocation2 + $0x8] sm:$0xff]  ;;  %v183_v14 = vld [vmem:[#allocation7 + $0x30] sm:$0xff] }
  0x4f   :  { %521 = vmatpush3.bf16.msra.mxu0 %v518_v3  ;;  %v530_v13 = vpack.c.bf16 %v182_v11, %v181_v10  ;;  %v184_v15 = vld [vmem:[#allocation7 + $0x38] sm:$0xff]  ;;  %v185_v17 = vld [vmem:[#allocation7 + $0x40] sm:$0xff]  ;;  %v186_v18 = vld [vmem:[#allocation7 + $0x48] sm:$0xff] }
  0x50   :  { %523 = vmatprep.subr.bf16.mxu1 %v522_v6  ;;  %v534_v16 = vpack.c.bf16 %v184_v15, %v183_v14  ;;  %v538_v19 = vpack.c.bf16 %v186_v18, %v185_v17  ;;  %v187_v20 = vld [vmem:[#allocation7 + $0x50] sm:$0xff]  ;;  %v188_v21 = vld [vmem:[#allocation7 + $0x58] sm:$0xff]  ;;  %v189_v23 = vld [vmem:[#allocation7 + $0x60] sm:$0xff] }
  0x51   :  { %525 = vmatpush3.bf16.msra.mxu1 %v522_v6  ;;  %v542_v22 = vpack.c.bf16 %v188_v21, %v187_v20  ;;  %v190_v24 = vld [vmem:[#allocation7 + $0x68] sm:$0xff]  ;;  %v191_v26 = vld [vmem:[#allocation7 + $0x70] sm:$0xff]  ;;  %v192_v27 = vld [vmem:[#allocation7 + $0x78] sm:$0xff] }
  0x52   :  { %527 = vmatprep.subr.bf16.mxu1 %v526_v9  ;;  %446 = vmatmul.mubr.msk.f32.vlgmr.msra.gmra.mrb[0].mxu0 %vm93_vm0, %v83_v12  ;;  %v546_v25 = vpack.c.bf16 %v190_v24, %v189_v23  ;;  %v550_v28 = vpack.c.bf16 %v192_v27, %v191_v26  ;;  %v277_v29 = vld [vmem:[#allocation8] sm:$0xff]  ;;  %v278_v30 = vld [vmem:[#allocation8 + $0x8] sm:$0xff]  ;;  %v279_v31 = vld [vmem:[#allocation8 + $0x10] sm:$0xff] }
  0x53   :  { %v554_v32 = vpack.c.bf16 %v278_v30, %v277_v29  ;;  %v280_v33 = vld [vmem:[#allocation8 + $0x18] sm:$0xff]  ;;  %v281_v35 = vld [vmem:[#allocation8 + $0x20] sm:$0xff]  ;;  %v282_v36 = vld [vmem:[#allocation8 + $0x28] sm:$0xff] }
  0x54   :  { %v558_v34 = vpack.c.bf16 %v280_v33, %v279_v31  ;;  %v562_v37 = vpack.c.bf16 %v282_v36, %v281_v35  ;;  %v283_v38 = vld [vmem:[#allocation8 + $0x30] sm:$0xff]  ;;  %v284_v39 = vld [vmem:[#allocation8 + $0x38] sm:$0xff]  ;;  %v285_v41 = vld [vmem:[#allocation8 + $0x40] sm:$0xff] }
  0x55   :  { %529 = vmatpush3.bf16.msra.mxu1 %v526_v9  ;;  %555 = vmatprep.subr.bf16.mxu0 %v554_v32  ;;  %v566_v40 = vpack.c.bf16 %v284_v39, %v283_v38  ;;  %v286_v42 = vld [vmem:[#allocation8 + $0x48] sm:$0xff]  ;;  %v287_v44 = vld [vmem:[#allocation8 + $0x50] sm:$0xff]  ;;  %v288_v45 = vld [vmem:[#allocation8 + $0x58] sm:$0xff] }
  0x56   :  { %531 = vmatprep.subr.bf16.mxu1 %v530_v13  ;;  %557 = vmatpush3.bf16.msra.mxu0 %v554_v32  ;;  %v570_v43 = vpack.c.bf16 %v286_v42, %v285_v41  ;;  %v574_v46 = vpack.c.bf16 %v288_v45, %v287_v44  ;;  %v289_v47 = vld [vmem:[#allocation8 + $0x60] sm:$0xff]  ;;  %v290_v48 = vld [vmem:[#allocation8 + $0x68] sm:$0xff]  ;;  %v291_v57 = vld [vmem:[#allocation8 + $0x70] sm:$0xff] }
  0x57   :  { %559 = vmatprep.subr.bf16.mxu0 %v558_v34  ;;  %v578_v49 = vpack.c.bf16 %v290_v48, %v289_v47  ;;  %v396_v50 = vld [vmem:[%s861_s2] ss:$0 sm:$0xff]  ;;  %v292_v58 = vld [vmem:[#allocation8 + $0x78] sm:$0xff] }
  0x58   :  { %v582_v59 = vpack.c.bf16 %v292_v58, %v291_v57  ;;  %v399_v60 = vld [vmem:[%s863_s4] ss:$0 sm:$0xff] }
  0x59   :  { %533 = vmatpush3.bf16.msra.mxu1 %v530_v13  ;;  %v400_v3 = vld [vmem:[%s865_s6] ss:$0 sm:$0xff] }
  0x5a   :  { %535 = vmatprep.subr.bf16.mxu1 %v534_v16  ;;  %561 = vmatpush3.bf16.msra.mxu0 %v558_v34 }
  0x5b   :  { %563 = vmatprep.subr.bf16.mxu0 %v562_v37 }
  0x5d   :  { %537 = vmatpush3.bf16.msra.mxu1 %v534_v16 }
  0x5e   :  { %539 = vmatprep.subr.bf16.mxu1 %v538_v19  ;;  %565 = vmatpush3.bf16.msra.mxu0 %v562_v37 }
  0x5f   :  { %567 = vmatprep.subr.bf16.mxu0 %v566_v40 }
  0x61   :  { %541 = vmatpush3.bf16.msra.mxu1 %v538_v19 }
  0x62   :  { %543 = vmatprep.subr.bf16.mxu1 %v542_v22  ;;  %569 = vmatpush3.bf16.msra.mxu0 %v566_v40 }
  0x63   :  { %571 = vmatprep.subr.bf16.mxu0 %v570_v43 }
  0x65   :  { %545 = vmatpush3.bf16.msra.mxu1 %v542_v22 }
  0x66   :  { %547 = vmatprep.subr.bf16.mxu1 %v546_v25  ;;  %573 = vmatpush3.bf16.msra.mxu0 %v570_v43 }
  0x67   :  { %575 = vmatprep.subr.bf16.mxu0 %v574_v46 }
  0x69   :  { %549 = vmatpush3.bf16.msra.mxu1 %v546_v25 }
  0x6a   :  { %551 = vmatprep.subr.bf16.mxu1 %v550_v28  ;;  %577 = vmatpush3.bf16.msra.mxu0 %v574_v46 }
  0x6b   :  { %579 = vmatprep.subr.bf16.mxu0 %v578_v49 }
  0x6d   :  { %553 = vmatpush3.bf16.msra.mxu1 %v550_v28 }
  0x6e   :  { %581 = vmatpush3.bf16.msra.mxu0 %v578_v49 }
  0x6f   :  { %583 = vmatprep.subr.bf16.mxu0 %v582_v59 }
  0x72   :  { %585 = vmatpush3.bf16.msra.mxu0 %v582_v59 }
 0x125   :  { %v447_v51 = vpop.f32.mrb[0].mxu0 }
 0x126   :  { %v172_v52 = vadd.f32 %v447_v51, %v396_v50  ;;  %v166_v53 = vpop.f32.mrb[1].mxu0 }
 0x127   :  { %v167_v54 = vadd.f32 %v396_v50, %v166_v53 }
 0x128   :  { %v176_v56 = vmax.f32 %v172_v52, 0.0 }
 0x129   :  { %v175_v55 = vmax.f32 %v167_v54, 0.0 }
 0x12b   :  { %480 = vmatprep.mubr.f32.mxu1 %v175_v55 }
 0x12c   :  { %481 = vmatmul.mubr.f32.vlgmr.msra.gmra.mrb[0].mxu1 %v176_v56 }
 0x1ff   :  { %v482_v61 = vpop.f32.mrb[0].mxu1 }
 0x200   :  { %v272_v62 = vadd.f32 %v482_v61, %v399_v60  ;;  %v266_v63 = vpop.f32.mrb[1].mxu1 }
 0x201   :  { %v267_v0 = vadd.f32 %v399_v60, %v266_v63 }
 0x202   :  { %v276_v2 = vmax.f32 %v272_v62, 0.0 }
 0x203   :  { %v275_v1 = vmax.f32 %v267_v0, 0.0 }
 0x205   :  { %515 = vmatprep.mubr.f32.mxu0 %v275_v1 }
 0x206   :  { %516 = vmatmul.mubr.f32.vlgmr.msra.gmra.mrb[2].mxu0 %v276_v2 }
 0x2d9   :  { %v517_v4 = vpop.f32.mrb[2].mxu0 }
 0x2da   :  { %v372_v5 = vadd.f32 %v517_v4, %v400_v3  ;;  %v366_v6 = vpop.f32.mrb[3].mxu0 }
 0x2db   :  { %v367_v7 = vadd.f32 %v400_v3, %v366_v6 }
 0x2dc   :  { %376 = vst [vmem:[#allocation10 + $0x8] sm:$0xff] %v372_v5 }
 0x2dd   :  { %375 = vst [vmem:[#allocation10] sm:$0xff] %v367_v7 }
 0x2de   :  { %381 = vsyncadd [#allocation4], 128  ;;  %s717_s4 = smov [#allocation10]  }
 0x2df   :  { %s382_s9 = sshll.u32 %s717_s4, 4  ;;  %s383_s9 = int_to_ptr.vmem [resolvable:$true] %s382_s9 }
 0x2e0   :  { %s681_s10 = scalar_lea.vmem %s383_s9, 128  ;;  %s685_s11 = scalar_lea.vmem %s383_s9, 256 }
 0x2e1   :  { %p682_p4 = scmp.ne.s32.totalorder %s383_s9, %s681_s10  ;;  %p686_p5 = scmp.lt.s32.totalorder %s383_s9, %s383_s9 }
 0x2e2   :  { %p687_p6 = scmp.lt.s32.totalorder %s685_s11, %s681_s10 }
 0x2e4   :  { %p688_p7 = por %p687_p6, %p686_p5 }
 0x2e6   :  { %p689_p8 = pnand %p688_p7, %p682_p4 }
 0x2e8   :  { %692 = shalt.err (!%p689_p8)
}
 0x2e9   :  { %s693_s15 = scalar_lea.hbm %s866_s7, 128 }
 0x2ea   :  { %p694_p9 = scmp.ne.s32.totalorder %s866_s7, %s693_s15  ;;  %p697_p10 = scmp.lt.u32.totalorder %s693_s15, %s866_s7 }
 0x2ec   :  { %p699_p11 = pnand %p697_p10, %p694_p9 }
 0x2ee   :  { %702 = shalt.err (!%p699_p11)
}
 0x2ef   :  { %388 = dma.vmem_to_hbm [thread:$0]  %s383_s9, 128, %s866_s7, [#allocation4], %s713_s13, %s713_s13, %s714_s14  }
 0x2f0   :  { %709 = dma.done.wait [#allocation4], 256  }
 0x2f1   :  { %710 = vsyncadd [#allocation4], 4294967040 }
 0x2f2   :  { %392 = vsyncpa [#allocation3], 1 }
 0x2f3   :  { %393 = vsyncpa [#allocation6], 1 }
 0x2f4   :  { %394 = vsyncpa [#allocation9], 1 }
 0x2f5   :  { %395 = vsyncpa [#allocation4], 1 }

</bundles_post_ra>
